<compile_context>
chip_gen: v7x
topology: tpu7x:2x2x1
jax: 0.10.0
libtpu: 0.0.40
codegen_flags: <defaults>
</compile_context>

<pallas_src>
import functools

import jax
import jax.numpy as jnp
from jax import lax
from jax.experimental import pallas as pl
from jax.experimental.pallas import tpu as pltpu


def _round_up(a: int, b: int) -> int:
    return (a + b - 1) // b * b


def _similarity_kernel(x_ref, y_ref, inv_x_ref, inv_y_ref, o_ref, *, cast_bf16):
    # x_ref: (TM, H), y_ref: (TN, H), inv_x_ref: (TM, 1), inv_y_ref: (1, TN), o_ref: (TM, TN)
    x = x_ref[...]
    y = y_ref[...]
    if cast_bf16:
        x = x.astype(jnp.bfloat16)
        y = y.astype(jnp.bfloat16)
    # Raw matmul on the MXU, contracting the last dims (transposed-RHS contraction; no y.T).
    s = lax.dot_general(
        x, y,
        dimension_numbers=(((1,), (1,)), ((), ())),
        preferred_element_type=jnp.float32,
    )  # (TM, TN) f32
    # Scale-after-matmul with precomputed inverse norms (1/temp folded into inv_x).
    o_ref[...] = (s * inv_x_ref[...] * inv_y_ref[...]).astype(o_ref.dtype)


def _similarity_kernel_kblocked(x_ref, y_ref, inv_x_ref, inv_y_ref, o_ref, acc_ref, *,
                                cast_bf16):
    # Same as above but the contraction dim H is blocked over grid axis 2 (accumulator pattern).
    k = pl.program_id(2)

    @pl.when(k == 0)
    def _():
        acc_ref[...] = jnp.zeros_like(acc_ref)

    x = x_ref[...]
    y = y_ref[...]
    if cast_bf16:
        x = x.astype(jnp.bfloat16)
        y = y.astype(jnp.bfloat16)
    acc_ref[...] += lax.dot_general(
        x, y,
        dimension_numbers=(((1,), (1,)), ((), ())),
        preferred_element_type=jnp.float32,
    )

    @pl.when(k == pl.num_programs(2) - 1)
    def _():
        o_ref[...] = (acc_ref[...] * inv_x_ref[...] * inv_y_ref[...]).astype(o_ref.dtype)


def similarity(x, y, temp: float, eps: float = 1e-8,
               tm=None, tn=None, out_dtype=jnp.float32, matmul_in_bf16: bool = False):
    """Pallas equivalent of Similarity.forward for x:(Bx,1,H), y:(1,By,H) -> (Bx,By)."""
    assert x.ndim == 3 and y.ndim == 3 and x.shape[1] == 1 and y.shape[0] == 1
    assert x.shape[-1] == y.shape[-1]
    Bx, H = x.shape[0], x.shape[-1]
    By = y.shape[1]
    x2d = x.reshape(Bx, H)
    y2d = y.reshape(By, H)

    # Hoisted per-row inverse norms (f32 XLA reduces, computed exactly once per row).
    # 1/temp is folded into the x-side scale so the kernel needs no extra (TM,TN) multiply.
    xf = x2d.astype(jnp.float32)
    yf = y2d.astype(jnp.float32)
    inv_x = lax.rsqrt(jnp.maximum(jnp.sum(xf * xf, axis=-1, keepdims=True), eps * eps))
    inv_x = inv_x * jnp.float32(1.0 / temp)                                   # (Bx, 1)
    inv_y = lax.rsqrt(jnp.maximum(jnp.sum(yf * yf, axis=-1, keepdims=True), eps * eps))
    inv_y = inv_y.reshape(1, By)                                              # (1, By) lane-dense

    # Pad batch dims only to 128 (lane granularity).  Padded inv entries are ZERO, so padded
    # output rows/cols are exactly 0 (no 1/eps overflow) and are sliced off at the end.
    bx_p = _round_up(Bx, 128)
    by_p = _round_up(By, 128)
    if bx_p != Bx:
        x2d = jnp.pad(x2d, ((0, bx_p - Bx), (0, 0)))
        inv_x = jnp.pad(inv_x, ((0, bx_p - Bx), (0, 0)))
    if by_p != By:
        y2d = jnp.pad(y2d, ((0, by_p - By), (0, 0)))
        inv_y = jnp.pad(inv_y, ((0, 0), (0, by_p - By)))

    in_itemsize = jnp.dtype(x2d.dtype).itemsize
    out_itemsize = jnp.dtype(out_dtype).itemsize

    # Generation-aware scoped-VMEM budget (v5e/v6e: 128 MiB physical, v7x: 64 MiB per TC).
    try:
        vmem_cap = int(pltpu.get_tpu_info().vmem_capacity_bytes)
    except Exception:
        vmem_cap = 64 << 20   # conservative fallback valid on every generation
    vmem_budget = int(vmem_cap * 0.85)   # leave headroom for compiler scratch / spills

    def footprint(tm_, tn_, h_, acc=False):
        b = (2 * (tm_ + tn_) * h_ * in_itemsize      # double-buffered x / y tiles
             + 2 * tm_ * tn_ * out_itemsize          # double-buffered output tile
             + 2 * (tm_ + tn_) * 4                   # inv_x / inv_y vectors
             + (2 << 20))                            # misc headroom
        if acc:
            b += tm_ * tn_ * 4                       # f32 accumulator scratch
        return b

    # Output-N tile: MXU-native 256 when it divides the padded batch, otherwise 128.
    if tn is None:
        tn = 256 if by_p % 256 == 0 else 128
    # Grow TM as far as the VMEM budget allows (x tile is resident across the inner j axis,
    # so larger TM directly cuts the dominant y re-stream).
    if tm is None:
        for cand in (1024, 512, 256, 128):
            if bx_p % cand == 0 and footprint(cand, tn, H) <= vmem_budget:
                tm = cand
                break
    if tm is None:
        # Even a 128-row x tile with the whole H does not fit: K-block the contraction instead
        # of shrinking tiles below MXU-native sizes.
        tm = 256 if bx_p % 256 == 0 else 128
        use_kblock = True
    else:
        use_kblock = footprint(tm, tn, H) > vmem_budget

    # Guard explicitly supplied tiles against the (8, 128) layout constraint.
    assert tm % 8 == 0 and tn % 128 == 0, "tm must be a multiple of 8 and tn a multiple of 128"
    assert bx_p % tm == 0 and by_p % tn == 0, "tiles must divide the 128-padded batch sizes"

    grid_m = bx_p // tm
    grid_n = by_p // tn
    kernel_args = (x2d, y2d, inv_x, inv_y)
    cp = dict(vmem_limit_bytes=min(vmem_budget, vmem_cap))

    if not use_kblock:
        cost = pl.CostEstimate(
            flops=2 * bx_p * by_p * H,
            transcendentals=0,
            bytes_accessed=(bx_p * H * in_itemsize                 # x read once (resident over j)
                            + grid_m * by_p * H * in_itemsize      # y re-streamed per i
                            + bx_p * by_p * out_itemsize
                            + (bx_p + by_p) * 4),
        )
        out = pl.pallas_call(
            functools.partial(_similarity_kernel, cast_bf16=matmul_in_bf16),
            out_shape=jax.ShapeDtypeStruct((bx_p, by_p), out_dtype),
            grid=(grid_m, grid_n),
            in_specs=[
                pl.BlockSpec((tm, H), lambda i, j: (i, 0)),
                pl.BlockSpec((tn, H), lambda i, j: (j, 0)),
                pl.BlockSpec((tm, 1), lambda i, j: (i, 0)),
                pl.BlockSpec((1, tn), lambda i, j: (0, j)),
            ],
            out_specs=pl.BlockSpec((tm, tn), lambda i, j: (i, j)),
            compiler_params=pltpu.CompilerParams(
                dimension_semantics=("parallel", "parallel"), **cp),
            cost_estimate=cost,
        )(*kernel_args)
    else:
        # Very large H: block the contraction dim, keep tiles MXU-native.
        tk = 128
        for cand_k in (4096, 2048, 1024, 512, 256, 128):
            if footprint(tm, tn, cand_k, acc=True) <= vmem_budget:
                tk = cand_k
                break
        h_p = _round_up(H, tk)
        if h_p != H:
            # Zero columns contribute nothing to the dot; norms were computed pre-padding.
            x2d = jnp.pad(x2d, ((0, 0), (0, h_p - H)))
            y2d = jnp.pad(y2d, ((0, 0), (0, h_p - H)))
            kernel_args = (x2d, y2d, inv_x, inv_y)
        grid_k = h_p // tk
        cost = pl.CostEstimate(
            flops=2 * bx_p * by_p * h_p,
            transcendentals=0,
            bytes_accessed=(grid_n * bx_p * h_p * in_itemsize
                            + grid_m * by_p * h_p * in_itemsize
                            + bx_p * by_p * out_itemsize
                            + (bx_p + by_p) * 4),
        )
        out = pl.pallas_call(
            functools.partial(_similarity_kernel_kblocked, cast_bf16=matmul_in_bf16),
            out_shape=jax.ShapeDtypeStruct((bx_p, by_p), out_dtype),
            grid=(grid_m, grid_n, grid_k),
            in_specs=[
                pl.BlockSpec((tm, tk), lambda i, j, k: (i, k)),
                pl.BlockSpec((tn, tk), lambda i, j, k: (j, k)),
                pl.BlockSpec((tm, 1), lambda i, j, k: (i, 0)),
                pl.BlockSpec((1, tn), lambda i, j, k: (0, j)),
            ],
            out_specs=pl.BlockSpec((tm, tn), lambda i, j, k: (i, j)),
            scratch_shapes=[pltpu.VMEM((tm, tn), jnp.float32)],
            compiler_params=pltpu.CompilerParams(
                dimension_semantics=("parallel", "parallel", "arbitrary"), **cp),
            cost_estimate=cost,
        )(*kernel_args)

    if bx_p != Bx or by_p != By:
        out = out[:Bx, :By]
    return out


def _reference(x, y, temp, eps=1e-8):
    # Pure-JAX reference reproducing torch.nn.CosineSimilarity(dim=-1) + /temp
    # (per-row norm clamp; identical to the kernel for non-degenerate rows).
    xb, yb = jnp.broadcast_arrays(x, y)
    num = jnp.sum(xb * yb, axis=-1)
    nx = jnp.maximum(jnp.linalg.norm(xb, axis=-1), eps)
    ny = jnp.maximum(jnp.linalg.norm(yb, axis=-1), eps)
    return (num / (nx * ny)) / temp


if __name__ == "__main__":
    B, H = 8, 32
    temp = 0.05

    key = jax.random.PRNGKey(0)
    kx, ky = jax.random.split(key)
    # SimCSE-style broadcast shapes: (B, 1, H) vs (1, B, H) -> (B, B)
    x = jax.random.normal(kx, (B, 1, H), dtype=jnp.float32)
    y = jax.random.normal(ky, (1, B, H), dtype=jnp.float32)

    out = similarity(x, y, temp)
    jax.block_until_ready(out)

    ref = _reference(x, y, temp)
    assert out.shape == (B, B)
    assert jnp.allclose(out, ref, atol=1e-4, rtol=1e-4), "mismatch vs reference"

    print("KERNEL_OK")
</pallas_src>

<mosaic_0001>
module attributes {stable_mosaic.version = 11 : i64} {
  func.func @_similarity_kernel(%arg0: i32, %arg1: i32, %arg2: memref<128x32xf32, #tpu.memory_space<vmem>>, %arg3: memref<128x32xf32, #tpu.memory_space<vmem>>, %arg4: memref<128x1xf32, #tpu.memory_space<vmem>>, %arg5: memref<1x128xf32, #tpu.memory_space<vmem>>, %arg6: memref<128x128xf32, #tpu.memory_space<vmem>>) attributes {dimension_semantics = [#tpu.dimension_semantics<parallel>, #tpu.dimension_semantics<parallel>], iteration_bounds = array<i64: 1, 1>, scalar_prefetch = 0 : i64, scratch_operands = 0 : i64, tpu.core_type = #tpu.core_type<tc>, window_params = [{transform_indices = @transform_0, window_bounds = array<i64: 128, 32>}, {transform_indices = @transform_1, window_bounds = array<i64: 128, 32>}, {transform_indices = @transform_2, window_bounds = array<i64: 128, 1>}, {transform_indices = @transform_3, window_bounds = array<i64: 1, 128>}, {transform_indices = @transform_4, window_bounds = array<i64: 128, 128>}]} {
    %c0 = arith.constant 0 : index
    %c0_0 = arith.constant 0 : index
    %0 = vector.load %arg2[%c0, %c0_0] : memref<128x32xf32, #tpu.memory_space<vmem>>, vector<128x32xf32>
    %c0_1 = arith.constant 0 : index
    %c0_2 = arith.constant 0 : index
    %1 = vector.load %arg3[%c0_1, %c0_2] : memref<128x32xf32, #tpu.memory_space<vmem>>, vector<128x32xf32>
    %cst = arith.constant dense<0.000000e+00> : vector<128x128xf32>
    %2 = tpu.matmul %0, %1, %cst {dimension_numbers = #tpu.dot_dimension_numbers<[1], [1], [0], [0], [0, 0, 1, 0], [], []>} : vector<128x32xf32>, vector<128x32xf32>, vector<128x128xf32> -> vector<128x128xf32>
    %c0_3 = arith.constant 0 : index
    %c0_4 = arith.constant 0 : index
    %3 = vector.load %arg4[%c0_3, %c0_4] : memref<128x1xf32, #tpu.memory_space<vmem>>, vector<128x1xf32>
    %4 = vector.broadcast %3 : vector<128x1xf32> to vector<128x128xf32>
    %5 = arith.mulf %2, %4 : vector<128x128xf32>
    %c0_5 = arith.constant 0 : index
    %c0_6 = arith.constant 0 : index
    %6 = vector.load %arg5[%c0_5, %c0_6] : memref<1x128xf32, #tpu.memory_space<vmem>>, vector<1x128xf32>
    %7 = vector.broadcast %6 : vector<1x128xf32> to vector<128x128xf32>
    %8 = arith.mulf %5, %7 : vector<128x128xf32>
    %c0_7 = arith.constant 0 : index
    %c0_8 = arith.constant 0 : index
    %9 = vector.load %arg6[%c0_7, %c0_8] : memref<128x128xf32, #tpu.memory_space<vmem>>, vector<128x128xf32>
    tpu.vector_store %arg6[%c0_7, %c0_8], %8 {strides = array<i32>} : memref<128x128xf32, #tpu.memory_space<vmem>>, vector<128x128xf32>,
    return
  }
  func.func @transform_0(%arg0: i32, %arg1: i32) -> (i32, i32) {
    %c0_i32 = arith.constant 0 : i32
    %c0_i32_0 = arith.constant 0 : i32
    return %arg0, %c0_i32 : i32, i32
  }
  func.func @transform_1(%arg0: i32, %arg1: i32) -> (i32, i32) {
    %c0_i32 = arith.constant 0 : i32
    %c0_i32_0 = arith.constant 0 : i32
    return %arg1, %c0_i32 : i32, i32
  }
  func.func @transform_2(%arg0: i32, %arg1: i32) -> (i32, i32) {
    %c0_i32 = arith.constant 0 : i32
    %c0_i32_0 = arith.constant 0 : i32
    return %arg0, %c0_i32 : i32, i32
  }
  func.func @transform_3(%arg0: i32, %arg1: i32) -> (i32, i32) {
    %c0_i32 = arith.constant 0 : i32
    %c0_i32_0 = arith.constant 0 : i32
    return %c0_i32, %arg1 : i32, i32
  }
  func.func @transform_4(%arg0: i32, %arg1: i32) -> (i32, i32) {
    %c0_i32 = arith.constant 0 : i32
    return %arg0, %arg1 : i32, i32
  }
}

</mosaic_0001>

<bundles_post_ra>
// kernel: tpu_custom_call.1
= control target key start
LH: loop header
LB: loop body
LE: loop exit
PB: predicated region body
PF: predicated region fallthrough
CT: control target
= control target key end

     0   :  { %vm50_vm0 = vcmask 261120   ;;  %v674_v6 = vmov 0   ;;  %s969_s0 = inlined_call_operand.vmem [shape: f32[128,32], index: 0, kind: input, shape index: {}]   ;;  %s970_s1 = inlined_call_operand.vmem [shape: f32[128,32], index: 1, kind: input, shape index: {}]   ;;  %s971_s2 = inlined_call_operand.vmem [shape: f32[128,1], index: 2, kind: input, shape index: {}]   ;;  %s972_s3 = inlined_call_operand.vmem [shape: f32[1,128], index: 3, kind: input, shape index: {}]   ;;  %s973_s4 = inlined_call_operand.hbm [shape: f32[128,128], index: 4, kind: output, shape index: {}]  }
   0x1   :  { %v34_v0 = vld [vmem:[%s970_s1] sm:$0xff]  ;;  %v35_v1 = vld [vmem:[%s970_s1 + $0x8] sm:$0xff]  ;;  %v36_v2 = vld [vmem:[%s970_s1 + $0x10] sm:$0xff]  ;;  %649 = vset.pattern.permute.xlu1 %v674_v6  ;;  %648 = vset.pattern.permute.xlu0 %v674_v6 }
   0x2   :  { %v580_v3 = vpack.c.bf16 %v35_v1, %v34_v0  ;;  %vm714_vm1 = vmpackc.low %vm50_vm0, %vm50_vm0  ;;  %v37_v5 = vld [vmem:[%s970_s1 + $0x18] sm:$0xff]  ;;  %v18_v8 = vld [vmem:[%s969_s0] sm:$0xff] }
   0x3   :  { %v586_v7 = vpack.c.bf16 %v37_v5, %v36_v2  ;;  %v38_v9 = vld [vmem:[%s970_s1 + $0x20] sm:$0xff]  ;;  %v39_v10 = vld [vmem:[%s970_s1 + $0x28] sm:$0xff]  ;;  %556 = vmatprep.mubr.msk.f32.mxu0 %vm50_vm0, %v18_v8  ;;  %v294_v13 = vld [vmem:[%s971_s2 + $0x10] sm:$0xff] }
   0x4   :  { %582 = vmatprep.subr.msk.bf16.mxu0 %vm714_vm1, %v580_v3  ;;  %628 = vmatprep.subr.msk.bf16.mxu1 %vm714_vm1, %v580_v3  ;;  %v26_v11 = vld [vmem:[%s969_s0 + $0x40] sm:$0xff]  ;;  %v592_v12 = vpack.c.bf16 %v39_v10, %v38_v9  ;;  %v40_v15 = vld [vmem:[%s970_s1 + $0x30] sm:$0xff]  ;;  %v41_v16 = vld [vmem:[%s970_s1 + $0x38] sm:$0xff] }
   0x5   :  { %585 = vmatpush3.bf16.xpose.msk.msra.mxu0 %vm714_vm1, %v580_v3  ;;  %636 = vmatpush3.bf16.xpose.msk.msra.mxu1 %vm714_vm1, %v580_v3  ;;  %v292_v14 = vld [vmem:[%s971_s2] sm:$0xff]  ;;  %v295_v17 = vld [vmem:[%s971_s2 + $0x18] sm:$0xff]  ;;  %v293_v18 = vld [vmem:[%s971_s2 + $0x8] sm:$0xff] }
   0x6   :  { %588 = vmatprep.subr.msk.bf16.mxu0 %vm714_vm1, %v586_v7  ;;  %629 = vmatprep.subr.msk.bf16.mxu1 %vm714_vm1, %v586_v7 }
   0x7   :  { %568 = vmatprep.mubr.msk.f32.mxu1 %vm50_vm0, %v26_v11  ;;  %320 = vperm.xlu1 %649, %v294_v13  }
   0x8   :  { %310 = vperm.xlu0 %648, %v292_v14  }
   0xd   :  { %591 = vmatpush3.bf16.xpose.msk.msra.mxu0 %vm714_vm1, %v586_v7  ;;  %637 = vmatpush3.bf16.xpose.msk.msra.mxu1 %vm714_vm1, %v586_v7 }
   0xe   :  { %594 = vmatprep.subr.msk.bf16.mxu0 %vm714_vm1, %v592_v12  ;;  %630 = vmatprep.subr.msk.bf16.mxu1 %vm714_vm1, %v592_v12 }
   0xf   :  { %9 = vsyncpa [#allocation3], 0  ;;  %v598_v19 = vpack.c.bf16 %v41_v16, %v40_v15  ;;  %325 = vperm.xlu1 %649, %v295_v17   ;;  %315 = vperm.xlu0 %648, %v293_v18   ;;  %v297_v20 = vld [vmem:[%s971_s2 + $0x28] sm:$0xff]  ;;  %v296_v21 = vld [vmem:[%s971_s2 + $0x20] sm:$0xff] }
  0x10   :  { %v42_v22 = vld [vmem:[%s970_s1 + $0x40] sm:$0xff]  ;;  %v43_v23 = vld [vmem:[%s970_s1 + $0x48] sm:$0xff]  ;;  %v299_v24 = vld [vmem:[%s971_s2 + $0x38] sm:$0xff] }
  0x11   :  { %v298_v25 = vld [vmem:[%s971_s2 + $0x30] sm:$0xff]  ;;  %v604_v26 = vpack.c.bf16 %v43_v23, %v42_v22  ;;  %v301_v27 = vld [vmem:[%s971_s2 + $0x48] sm:$0xff]  ;;  %v300_v28 = vld [vmem:[%s971_s2 + $0x40] sm:$0xff] }
  0x12   :  { %v44_v29 = vld [vmem:[%s970_s1 + $0x50] sm:$0xff]  ;;  %v45_v30 = vld [vmem:[%s970_s1 + $0x58] sm:$0xff]  ;;  %v305_v34 = vld [vmem:[%s971_s2 + $0x68] sm:$0xff] }
  0x13   :  { %335 = vperm.xlu1 %649, %v297_v20   ;;  %330 = vperm.xlu0 %648, %v296_v21   ;;  %v303_v31 = vld [vmem:[%s971_s2 + $0x58] sm:$0xff]  ;;  %v302_v32 = vld [vmem:[%s971_s2 + $0x50] sm:$0xff]  ;;  %v610_v33 = vpack.c.bf16 %v45_v30, %v44_v29  ;;  %v304_v35 = vld [vmem:[%s971_s2 + $0x60] sm:$0xff] }
  0x14   :  { %v46_v36 = vld [vmem:[%s970_s1 + $0x60] sm:$0xff]  ;;  %v47_v37 = vld [vmem:[%s970_s1 + $0x68] sm:$0xff]  ;;  %v307_v38 = vld [vmem:[%s971_s2 + $0x78] sm:$0xff] }
  0x15   :  { %597 = vmatpush3.bf16.xpose.msk.msra.mxu0 %vm714_vm1, %v592_v12  ;;  %638 = vmatpush3.bf16.xpose.msk.msra.mxu1 %vm714_vm1, %v592_v12  ;;  %v306_v39 = vld [vmem:[%s971_s2 + $0x70] sm:$0xff]  ;;  %v616_v40 = vpack.c.bf16 %v47_v37, %v46_v36  ;;  %v49_v42 = vld [vmem:[%s970_s1 + $0x78] sm:$0xff]  ;;  %v19_v44 = vld [vmem:[%s969_s0 + $0x8] sm:$0xff] }
  0x16   :  { %600 = vmatprep.subr.msk.bf16.mxu0 %vm714_vm1, %v598_v19  ;;  %631 = vmatprep.subr.msk.bf16.mxu1 %vm714_vm1, %v598_v19  ;;  %v48_v41 = vld [vmem:[%s970_s1 + $0x70] sm:$0xff]  ;;  %v27_v45 = vld [vmem:[%s969_s0 + $0x48] sm:$0xff]  ;;  %v21_v48 = vld [vmem:[%s969_s0 + $0x18] sm:$0xff] }
  0x17   :  { %345 = vperm.xlu1 %649, %v299_v24   ;;  %340 = vperm.xlu0 %648, %v298_v25   ;;  %v622_v43 = vpack.c.bf16 %v49_v42, %v48_v41  ;;  %v20_v46 = vld [vmem:[%s969_s0 + $0x10] sm:$0xff]  ;;  %v29_v49 = vld [vmem:[%s969_s0 + $0x58] sm:$0xff]  ;;  %v22_v50 = vld [vmem:[%s969_s0 + $0x20] sm:$0xff] }
  0x18   :  { %v28_v47 = vld [vmem:[%s969_s0 + $0x50] sm:$0xff]  ;;  %v30_v51 = vld [vmem:[%s969_s0 + $0x60] sm:$0xff]  ;;  %v23_v52 = vld [vmem:[%s969_s0 + $0x28] sm:$0xff] }
  0x19   :  { %v31_v53 = vld [vmem:[%s969_s0 + $0x68] sm:$0xff]  ;;  %v24_v54 = vld [vmem:[%s969_s0 + $0x30] sm:$0xff]  ;;  %v25_v56 = vld [vmem:[%s969_s0 + $0x38] sm:$0xff] }
  0x1a   :  { %v32_v55 = vld [vmem:[%s969_s0 + $0x70] sm:$0xff]  ;;  %v33_v57 = vld [vmem:[%s969_s0 + $0x78] sm:$0xff]  ;;  %v938_v7 = vld [vmem:[%s972_s3] ss:$0 sm:$0xff]  ;;  %s675_s3 = smov [#allocation2]  }
  0x1b   :  { %355 = vperm.xlu1 %649, %v301_v27   ;;  %350 = vperm.xlu0 %648, %v300_v28   ;;  %s448_s30 = sshll.u32 %s675_s3, 4  ;;  %s449_s30 = int_to_ptr.vmem [resolvable:$true] %s448_s30 }
  0x1c   :  { %s650_s5 = scalar_lea.vmem %s449_s30, 2048  ;;  %p655_p1 = scmp.lt.s32.totalorder %s449_s30, %s449_s30 }
  0x1d   :  { %603 = vmatpush3.bf16.xpose.msk.msra.mxu0 %vm714_vm1, %v598_v19  ;;  %639 = vmatpush3.bf16.xpose.msk.msra.mxu1 %vm714_vm1, %v598_v19  ;;  %p651_p0 = scmp.ne.s32.totalorder %s449_s30, %s650_s5  ;;  %p656_p2 = scmp.lt.s32.totalorder %s650_s5, %s650_s5 }
  0x1e   :  { %606 = vmatprep.subr.msk.bf16.mxu0 %vm714_vm1, %v604_v26  ;;  %632 = vmatprep.subr.msk.bf16.mxu1 %vm714_vm1, %v604_v26 }
  0x1f   :  { %365 = vperm.xlu1 %649, %v303_v31   ;;  %360 = vperm.xlu0 %648, %v302_v32   ;;  %p657_p3 = por %p656_p2, %p655_p1 }
  0x21   :  { %p658_p4 = pnand %p657_p3, %p651_p0 }
  0x23   :  { %375 = vperm.xlu1 %649, %v305_v34   ;;  %370 = vperm.xlu0 %648, %v304_v35  }
  0x25   :  { %609 = vmatpush3.bf16.xpose.msk.msra.mxu0 %vm714_vm1, %v604_v26  ;;  %640 = vmatpush3.bf16.xpose.msk.msra.mxu1 %vm714_vm1, %v604_v26 }
  0x26   :  { %612 = vmatprep.subr.msk.bf16.mxu0 %vm714_vm1, %v610_v33  ;;  %633 = vmatprep.subr.msk.bf16.mxu1 %vm714_vm1, %v610_v33 }
  0x27   :  { %385 = vperm.xlu1 %649, %v307_v38   ;;  %380 = vperm.xlu0 %648, %v306_v39  }
  0x2d   :  { %615 = vmatpush3.bf16.xpose.msk.msra.mxu0 %vm714_vm1, %v610_v33  ;;  %641 = vmatpush3.bf16.xpose.msk.msra.mxu1 %vm714_vm1, %v610_v33 }
  0x2e   :  { %618 = vmatprep.subr.msk.bf16.mxu0 %vm714_vm1, %v616_v40  ;;  %634 = vmatprep.subr.msk.bf16.mxu1 %vm714_vm1, %v616_v40 }
  0x35   :  { %621 = vmatpush3.bf16.xpose.msk.msra.mxu0 %vm714_vm1, %v616_v40  ;;  %642 = vmatpush3.bf16.xpose.msk.msra.mxu1 %vm714_vm1, %v616_v40 }
  0x36   :  { %624 = vmatprep.subr.msk.bf16.mxu0 %vm714_vm1, %v622_v43  ;;  %635 = vmatprep.subr.msk.bf16.mxu1 %vm714_vm1, %v622_v43 }
  0x3d   :  { %627 = vmatpush3.bf16.xpose.msk.msra.mxu0 %vm714_vm1, %v622_v43  ;;  %643 = vmatpush3.bf16.xpose.msk.msra.mxu1 %vm714_vm1, %v622_v43 }
  0x44   :  { %557 = vmatmul.mubr.msk.f32.vlgmr.msra.gmra.mrb[0].mxu0 %vm50_vm0, %v19_v44  ;;  %569 = vmatmul.mubr.msk.f32.vlgmr.msra.gmra.mrb[0].mxu1 %vm50_vm0, %v27_v45 }
  0x45   :  { %559 = vmatprep.mubr.msk.f32.mxu0 %vm50_vm0, %v20_v46  ;;  %571 = vmatprep.mubr.msk.f32.mxu1 %vm50_vm0, %v28_v47 }
  0x48   :  { %560 = vmatmul.mubr.msk.f32.gmra.mrb[2].mxu0 %vm50_vm0, %v21_v48  ;;  %572 = vmatmul.mubr.msk.f32.gmra.mrb[2].mxu1 %vm50_vm0, %v29_v49 }
  0x49   :  { %562 = vmatprep.mubr.msk.f32.mxu0 %vm50_vm0, %v22_v50  ;;  %574 = vmatprep.mubr.msk.f32.mxu1 %vm50_vm0, %v30_v51 }
  0x4c   :  { %563 = vmatmul.mubr.msk.f32.gmra.mrb[4].mxu0 %vm50_vm0, %v23_v52  ;;  %575 = vmatmul.mubr.msk.f32.gmra.mrb[4].mxu1 %vm50_vm0, %v31_v53 }
  0x4d   :  { %565 = vmatprep.mubr.msk.f32.mxu0 %vm50_vm0, %v24_v54  ;;  %577 = vmatprep.mubr.msk.f32.mxu1 %vm50_vm0, %v32_v55 }
  0x50   :  { %566 = vmatmul.mubr.msk.f32.gmra.mrb[6].mxu0 %vm50_vm0, %v25_v56  ;;  %578 = vmatmul.mubr.msk.f32.gmra.mrb[6].mxu1 %vm50_vm0, %v33_v57 }
  0x86   :  { %v321_v58 = vpop.permute.xlu1 %320 }
  0x87   :  { %v311_v59 = vpop.permute.xlu0 %310 }
  0x8e   :  { %v326_v60 = vpop.permute.xlu1 %325  ;;  %v316_v61 = vpop.permute.xlu0 %315 }
  0x92   :  { %v336_v62 = vpop.permute.xlu1 %335  ;;  %v331_v63 = vpop.permute.xlu0 %330 }
  0x96   :  { %v346_v0 = vpop.permute.xlu1 %345  ;;  %v933_v1 = vpop.permute.xlu0 %340 }
  0x9a   :  { %v356_v2 = vpop.permute.xlu1 %355  ;;  %v351_v3 = vpop.permute.xlu0 %350 }
  0x9e   :  { %v366_v4 = vpop.permute.xlu1 %365  ;;  %v361_v5 = vpop.permute.xlu0 %360 }
  0xa2   :  { %v376_v15 = vpop.permute.xlu1 %375  ;;  %v371_v16 = vpop.permute.xlu0 %370 }
  0xa6   :  { %v386_v41 = vpop.permute.xlu1 %385  ;;  %v381_v42 = vpop.permute.xlu0 %380 }
 0x117   :  { %v558_v6 = vpop.f32.mrb[0].mxu0  ;;  %v570_v8 = vpop.f32.mrb[0].mxu1 }
 0x118   :  { %v389_v9 = vmul.f32 %v558_v6, %v316_v61  ;;  %v397_v10 = vmul.f32 %v570_v8, %v356_v2  ;;  %v213_v11 = vpop.f32.mrb[1].mxu0  ;;  %v253_v12 = vpop.f32.mrb[1].mxu1 }
 0x119   :  { %v388_v13 = vmul.f32 %v311_v59, %v213_v11  ;;  %v396_v14 = vmul.f32 %v351_v3, %v253_v12 }
 0x11a   :  { %v412_v17 = vmul.f32 %v938_v7, %v389_v9  ;;  %v420_v18 = vmul.f32 %v938_v7, %v397_v10 }
 0x11b   :  { %v411_v19 = vmul.f32 %v938_v7, %v388_v13  ;;  %v419_v20 = vmul.f32 %v938_v7, %v396_v14  ;;  %v561_v21 = vpop.f32.mrb[2].mxu0  ;;  %v573_v22 = vpop.f32.mrb[2].mxu1 }
 0x11c   :  { %428 = vst [vmem:[#allocation2 + $0x8] sm:$0xff] %v412_v17  ;;  %436 = vst [vmem:[#allocation2 + $0x48] sm:$0xff] %v420_v18  ;;  %v391_v23 = vmul.f32 %v561_v21, %v326_v60  ;;  %v399_v24 = vmul.f32 %v573_v22, %v366_v4  ;;  %v223_v25 = vpop.f32.mrb[3].mxu0  ;;  %v263_v26 = vpop.f32.mrb[3].mxu1 }
 0x11d   :  { %427 = vst [vmem:[#allocation2] sm:$0xff] %v411_v19  ;;  %435 = vst [vmem:[#allocation2 + $0x40] sm:$0xff] %v419_v20  ;;  %v390_v27 = vmul.f32 %v321_v58, %v223_v25  ;;  %v398_v28 = vmul.f32 %v361_v5, %v263_v26 }
 0x11e   :  { %v414_v29 = vmul.f32 %v938_v7, %v391_v23  ;;  %v422_v30 = vmul.f32 %v938_v7, %v399_v24 }
 0x11f   :  { %v413_v31 = vmul.f32 %v938_v7, %v390_v27  ;;  %v421_v32 = vmul.f32 %v938_v7, %v398_v28  ;;  %v564_v33 = vpop.f32.mrb[4].mxu0  ;;  %v576_v34 = vpop.f32.mrb[4].mxu1 }
 0x120   :  { %430 = vst [vmem:[#allocation2 + $0x18] sm:$0xff] %v414_v29  ;;  %438 = vst [vmem:[#allocation2 + $0x58] sm:$0xff] %v422_v30  ;;  %v393_v35 = vmul.f32 %v564_v33, %v336_v62  ;;  %v401_v36 = vmul.f32 %v576_v34, %v376_v15  ;;  %v233_v37 = vpop.f32.mrb[5].mxu0  ;;  %v273_v38 = vpop.f32.mrb[5].mxu1 }
 0x121   :  { %429 = vst [vmem:[#allocation2 + $0x10] sm:$0xff] %v413_v31  ;;  %437 = vst [vmem:[#allocation2 + $0x50] sm:$0xff] %v421_v32  ;;  %v392_v39 = vmul.f32 %v331_v63, %v233_v37  ;;  %v400_v40 = vmul.f32 %v371_v16, %v273_v38 }
 0x122   :  { %v416_v43 = vmul.f32 %v938_v7, %v393_v35  ;;  %v424_v44 = vmul.f32 %v938_v7, %v401_v36 }
 0x123   :  { %v415_v45 = vmul.f32 %v938_v7, %v392_v39  ;;  %v423_v46 = vmul.f32 %v938_v7, %v400_v40  ;;  %v567_v47 = vpop.f32.mrb[6].mxu0  ;;  %v579_v48 = vpop.f32.mrb[6].mxu1 }
 0x124   :  { %432 = vst [vmem:[#allocation2 + $0x28] sm:$0xff] %v416_v43  ;;  %440 = vst [vmem:[#allocation2 + $0x68] sm:$0xff] %v424_v44  ;;  %v395_v49 = vmul.f32 %v567_v47, %v346_v0  ;;  %v403_v50 = vmul.f32 %v579_v48, %v386_v41  ;;  %v243_v51 = vpop.f32.mrb[7].mxu0  ;;  %v283_v52 = vpop.f32.mrb[7].mxu1 }
 0x125   :  { %431 = vst [vmem:[#allocation2 + $0x20] sm:$0xff] %v415_v45  ;;  %439 = vst [vmem:[#allocation2 + $0x60] sm:$0xff] %v423_v46  ;;  %v394_v53 = vmul.f32 %v933_v1, %v243_v51  ;;  %v402_v54 = vmul.f32 %v381_v42, %v283_v52 }
 0x126   :  { %v418_v55 = vmul.f32 %v938_v7, %v395_v49  ;;  %v426_v56 = vmul.f32 %v938_v7, %v403_v50 }
 0x127   :  { %v417_v57 = vmul.f32 %v938_v7, %v394_v53  ;;  %v425_v58 = vmul.f32 %v938_v7, %v402_v54 }
 0x128   :  { %434 = vst [vmem:[#allocation2 + $0x38] sm:$0xff] %v418_v55  ;;  %442 = vst [vmem:[#allocation2 + $0x78] sm:$0xff] %v426_v56 }
 0x129   :  { %433 = vst [vmem:[#allocation2 + $0x30] sm:$0xff] %v417_v57  ;;  %441 = vst [vmem:[#allocation2 + $0x70] sm:$0xff] %v425_v58 }
 0x12a   :  { %661 = shalt.err (!%p658_p4)
}
 0x12b   :  { %s662_s8 = scalar_lea.hbm %s973_s4, 2048 }
 0x12c   :  { %p663_p5 = scmp.ne.s32.totalorder %s973_s4, %s662_s8  ;;  %p666_p6 = scmp.lt.u32.totalorder %s662_s8, %s973_s4 }
 0x12e   :  { %p668_p7 = pnand %p666_p6, %p663_p5 }
 0x130   :  { %671 = shalt.err (!%p668_p7)
}
 0x131   :  { %s676_s13 = smov 128   ;;  %s677_s14 = smov 8  }
 0x132   :  { %454 = dma.vmem_to_hbm [thread:$0]  %s449_s30, 2048, %s973_s4, [#allocation3], %s676_s13, %s676_s13, %s677_s14  }
 0x133   :  { %672 = dma.done.wait [#allocation3], 2048  }
 0x134   :  { %673 = vsyncadd [#allocation3], 4294965248 }
 0x135   :  { %458 = vsyncpa [#allocation3], 1 }

</bundles_post_ra>
